<compile_context>
chip_gen: v7x
topology: tpu7x:2x2x1
jax: 0.10.0
libtpu: 0.0.40
codegen_flags: <defaults>
</compile_context>

<pallas_src>
import math

import jax
import jax.numpy as jnp
from jax.experimental import pallas as pl
from jax.experimental.pallas import tpu as pltpu

_LANES = 128


def _scale_kernel(x_ref, smin_ref, smax_ref, o_ref):
    # x_ref/o_ref:       (bn, tf) tile of the flattened (N, F) input/output.
    # smin_ref/smax_ref: (1, tf) scale tile, resident across batch blocks.
    smin = smin_ref[...].astype(jnp.float32)
    smax = smax_ref[...].astype(jnp.float32)
    x = x_ref[...].astype(jnp.float32)
    # out = min + (max - min) * x   (elementwise, VPU; f32 accumulate)
    o_ref[...] = (smin + (smax - smin) * x).astype(o_ref.dtype)


def _round_up(v, m):
    return ((v + m - 1) // m) * m


def _round_down(v, m):
    return (v // m) * m


def _target_tile_bytes():
    """Per-generation x/out tile budget (stays under default scoped VMEM)."""
    try:
        kind = jax.devices()[0].device_kind.lower()
    except Exception:
        return 2 << 20
    if ("v6" in kind) or ("v7" in kind):
        # 32 MiB default scoped VMEM: 2*2*4 MiB (x/out double-buffered)
        # + <~2 MiB scales ≈ 18 MiB.
        return 4 << 20
    # v5e & older: 16 MiB default scoped VMEM → ~9 MiB working set.
    return 2 << 20


def scale_forward(x, scale_min, scale_max, *, min_pallas_elements=1 << 16):
    """Apply the Scale module forward pass.

    x:          (N, *shape)
    scale_min:  shape == x.shape[1:]
    scale_max:  shape == x.shape[1:]
    returns     x.shape, dtype == x.dtype
    """
    orig_shape = x.shape
    n = orig_shape[0]
    f = math.prod(orig_shape[1:])
    assert scale_min.shape == tuple(orig_shape[1:])
    assert scale_max.shape == tuple(orig_shape[1:])

    # Tiny inputs: a standalone kernel (custom-call boundary + per-step
    # overhead + extra HBM round trip) loses to a fused XLA elementwise op.
    if n * f < min_pallas_elements:
        out = scale_min[None] + (scale_max[None] - scale_min[None]) * x
        return out.astype(x.dtype)

    itemsize = jnp.dtype(x.dtype).itemsize
    # dtype-aware sublane packing: 8 rows f32, 16 bf16, 32 int8/fp8.
    sublanes = 8 * max(1, 4 // itemsize)

    # Free (metadata-only) reshapes — no padding, no copies.
    x2 = x.reshape(n, f)
    smin2 = scale_min.reshape(1, f)
    smax2 = scale_max.reshape(1, f)

    target_elems = max(_target_tile_bytes() // itemsize, sublanes * _LANES)
    f_ext = _round_up(f, _LANES)
    n_ext = _round_up(n, sublanes)

    # Feature tile: multiple of 128, sized so even the minimum batch block
    # (`sublanes` rows) stays within the tile budget. Keeps scale tiles small.
    tf = min(f_ext, max(_LANES, _round_down(target_elems // sublanes, _LANES)))
    # Batch tile: multiple of the packed sublane count, fills the rest of the
    # budget. Partial boundary blocks (bn > n or tf beyond f) are handled by
    # Pallas: garbage reads, discarded writes — safe for elementwise math.
    bn = min(n_ext, max(sublanes, _round_down(target_elems // tf, sublanes)))

    grid_f = pl.cdiv(f, tf)
    grid_n = pl.cdiv(n, bn)

    if grid_f >= 2:
        # Feature blocks outer (megacore split axis, extent >= 2), batch
        # innermost so the scale block index is constant across the inner
        # loop → scales stay resident in VMEM.
        grid = (grid_f, grid_n)
        x_spec = pl.BlockSpec((bn, tf), lambda fi, ni: (ni, fi))
        s_spec = pl.BlockSpec((1, tf), lambda fi, ni: (0, fi))
        dim_sem = ("parallel", "parallel")
    else:
        # Single feature block: scale residency is automatic, so expose the
        # batch-block axis as the (only) parallel axis for megacore.
        grid = (grid_n,)
        x_spec = pl.BlockSpec((bn, tf), lambda ni: (ni, 0))
        s_spec = pl.BlockSpec((1, tf), lambda ni: (0, 0))
        dim_sem = ("parallel",)

    out2 = pl.pallas_call(
        _scale_kernel,
        out_shape=jax.ShapeDtypeStruct((n, f), x.dtype),
        grid=grid,
        in_specs=[x_spec, s_spec, s_spec],
        out_specs=x_spec,
        compiler_params=pltpu.CompilerParams(dimension_semantics=dim_sem),
    )(x2, smin2, smax2)

    return out2.reshape(orig_shape)


if __name__ == "__main__":
    key = jax.random.PRNGKey(0)

    # Small shapes consistent with the module: batch=2, channels=4, spatial=16.
    N, C, H, W = 2, 4, 16, 16
    x = jax.random.normal(key, (N, C, H, W), dtype=jnp.float32)

    # Deterministic buffer init exactly as in Scale.__init__ (min=-1, max=1).
    scale_min = jnp.ones((C, H, W), dtype=jnp.float32) * (-1.0)
    scale_max = jnp.ones((C, H, W), dtype=jnp.float32) * (1.0)

    # min_pallas_elements=0 forces the Pallas path even at this tiny demo size.
    out = scale_forward(x, scale_min, scale_max, min_pallas_elements=0)
    out = jax.block_until_ready(out)

    # Reference check (plain JAX broadcast, mirrors the PyTorch expand_as math).
    ref = scale_min[None] + (scale_max[None] - scale_min[None]) * x
    assert out.shape == x.shape and out.dtype == x.dtype
    assert jnp.allclose(out, ref, atol=1e-6), "mismatch vs reference"

    print("KERNEL_OK")
</pallas_src>

<mosaic_0001>
module attributes {stable_mosaic.version = 11 : i64} {
  func.func @_scale_kernel(%arg0: i32, %arg1: memref<8x1024xf32, #tpu.memory_space<vmem>>, %arg2: memref<1x1024xf32, #tpu.memory_space<vmem>>, %arg3: memref<1x1024xf32, #tpu.memory_space<vmem>>, %arg4: memref<8x1024xf32, #tpu.memory_space<vmem>>) attributes {dimension_semantics = [#tpu.dimension_semantics<parallel>], iteration_bounds = array<i64: 1>, scalar_prefetch = 0 : i64, scratch_operands = 0 : i64, tpu.core_type = #tpu.core_type<tc>, window_params = [{transform_indices = @transform_0, window_bounds = array<i64: 8, 1024>}, {pipeline_mode = #tpu.pipeline_mode<synchronous>, transform_indices = @transform_1, window_bounds = array<i64: 1, 1024>}, {pipeline_mode = #tpu.pipeline_mode<synchronous>, transform_indices = @transform_2, window_bounds = array<i64: 1, 1024>}, {transform_indices = @transform_3, window_bounds = array<i64: 8, 1024>}]} {
    %c0 = arith.constant 0 : index
    %c0_0 = arith.constant 0 : index
    %0 = vector.load %arg2[%c0, %c0_0] : memref<1x1024xf32, #tpu.memory_space<vmem>>, vector<1x1024xf32>
    %c0_1 = arith.constant 0 : index
    %c0_2 = arith.constant 0 : index
    %1 = vector.load %arg3[%c0_1, %c0_2] : memref<1x1024xf32, #tpu.memory_space<vmem>>, vector<1x1024xf32>
    %c0_3 = arith.constant 0 : index
    %c0_4 = arith.constant 0 : index
    %2 = vector.load %arg1[%c0_3, %c0_4] : memref<8x1024xf32, #tpu.memory_space<vmem>>, vector<8x1024xf32>
    %3 = arith.subf %1, %0 : vector<1x1024xf32>
    %4 = vector.broadcast %3 : vector<1x1024xf32> to vector<8x1024xf32>
    %5 = arith.mulf %4, %2 : vector<8x1024xf32>
    %6 = vector.broadcast %0 : vector<1x1024xf32> to vector<8x1024xf32>
    %7 = arith.addf %6, %5 : vector<8x1024xf32>
    %c0_5 = arith.constant 0 : index
    %c0_6 = arith.constant 0 : index
    %8 = vector.load %arg4[%c0_5, %c0_6] : memref<8x1024xf32, #tpu.memory_space<vmem>>, vector<8x1024xf32>
    tpu.vector_store %arg4[%c0_5, %c0_6], %7 {strides = array<i32>} : memref<8x1024xf32, #tpu.memory_space<vmem>>, vector<8x1024xf32>,
    return
  }
  func.func @transform_0(%arg0: i32) -> (i32, i32) {
    %c0_i32 = arith.constant 0 : i32
    %c0_i32_0 = arith.constant 0 : i32
    return %arg0, %c0_i32 : i32, i32
  }
  func.func @transform_1(%arg0: i32) -> (i32, i32) {
    %c0_i32 = arith.constant 0 : i32
    %c0_i32_0 = arith.constant 0 : i32
    %c0_i32_1 = arith.constant 0 : i32
    return %c0_i32, %c0_i32_0 : i32, i32
  }
  func.func @transform_2(%arg0: i32) -> (i32, i32) {
    %c0_i32 = arith.constant 0 : i32
    %c0_i32_0 = arith.constant 0 : i32
    %c0_i32_1 = arith.constant 0 : i32
    return %c0_i32, %c0_i32_0 : i32, i32
  }
  func.func @transform_3(%arg0: i32) -> (i32, i32) {
    %c0_i32 = arith.constant 0 : i32
    %c0_i32_0 = arith.constant 0 : i32
    return %arg0, %c0_i32 : i32, i32
  }
}

</mosaic_0001>

<bundles_post_ra>
// kernel: tpu_custom_call.1
= control target key start
LH: loop header
LB: loop body
LE: loop exit
PB: predicated region body
PF: predicated region fallthrough
CT: control target
= control target key end

     0   :  { %8 = vsyncpa [#allocation3], 0  ;;  %s583_s0 = inlined_call_operand.hbm [shape: f32[2,1024], index: 0, kind: input, shape index: {}]   ;;  %s584_s1 = inlined_call_operand.hbm [shape: f32[1,1024], index: 1, kind: input, shape index: {}]   ;;  %s585_s2 = inlined_call_operand.hbm [shape: f32[1,1024], index: 2, kind: input, shape index: {}]   ;;  %s586_s3 = inlined_call_operand.hbm [shape: f32[2,1024], index: 3, kind: output, shape index: {}]  }
   0x1   :  { %9 = vsyncpa [#allocation6], 0 }
   0x2   :  { %10 = vsyncpa [#allocation4], 0 }
   0x3   :  { %15 = vsyncadd [#allocation3], 768  ;;  %s476_s12 = smov [#allocation5]   ;;  %s477_s14 = smov [#allocation2]  }
   0x4   :  { %s29_s13 = sshll.u32 %s476_s12, 4  ;;  %s16_s15 = sshll.u32 %s477_s14, 4  ;;  %s30_s13 = int_to_ptr.vmem [resolvable:$true] %s29_s13  ;;  %s503_s15 = int_to_ptr.vmem [resolvable:$true] %s16_s15 }
   0x5   :  { %s382_s18 = scalar_lea.hbm %s584_s1, 128 }
   0x6   :  { %p383_p0 = scmp.ne.s32.totalorder %s584_s1, %s382_s18  ;;  %p386_p1 = scmp.lt.u32.totalorder %s382_s18, %s584_s1 }
   0x8   :  { %p388_p2 = pnand %p386_p1, %p383_p0 }
   0xa   :  { %391 = shalt.err (!%p388_p2)
}
   0xb   :  { %s392_s23 = scalar_lea.vmem %s30_s13, 128  ;;  %p397_p4 = scmp.lt.s32.totalorder %s30_s13, %s30_s13 }
   0xc   :  { %p393_p3 = scmp.ne.s32.totalorder %s30_s13, %s392_s23  ;;  %p398_p5 = scmp.lt.s32.totalorder %s392_s23, %s392_s23 }
   0xe   :  { %p399_p6 = por %p398_p5, %p397_p4 }
  0x10   :  { %p400_p7 = pnand %p399_p6, %p393_p3 }
  0x12   :  { %403 = shalt.err (!%p400_p7)
}
  0x13   :  { %32 = dma.hbm_to_vmem [thread:$0]  %s584_s1, 128, %s30_s13, [#allocation6]  }
  0x14   :  { %s404_s28 = scalar_lea.hbm %s583_s0, 256 }
  0x15   :  { %p405_p8 = scmp.ne.s32.totalorder %s583_s0, %s404_s28  ;;  %p408_p9 = scmp.lt.u32.totalorder %s404_s28, %s583_s0 }
  0x17   :  { %p410_p10 = pnand %p408_p9, %p405_p8 }
  0x19   :  { %413 = shalt.err (!%p410_p10)
}
  0x1a   :  { %s414_s6 = scalar_lea.vmem %s503_s15, 256  ;;  %s418_s1 = scalar_lea.vmem %s503_s15, 1024 }
  0x1b   :  { %p415_p11 = scmp.ne.s32.totalorder %s503_s15, %s414_s6  ;;  %p419_p12 = scmp.lt.s32.totalorder %s503_s15, %s503_s15 }
  0x1c   :  { %p420_p13 = scmp.lt.s32.totalorder %s418_s1, %s414_s6 }
  0x1e   :  { %p421_p0 = por %p420_p13, %p419_p12 }
  0x20   :  { %p422_p1 = pnand %p421_p0, %p415_p11 }
  0x22   :  { %425 = shalt.err (!%p422_p1)
}
  0x23   :  { %s478_s7 = smov 256   ;;  %s479_s8 = smov 16  }
  0x24   :  { %22 = dma.hbm_to_vmem [thread:$0]  %s583_s0, 256, %s503_s15, [#allocation3], %s478_s7, %s478_s7, %s479_s8  }
  0x25   :  { %s480_s11 = smov [#allocation7]   ;;  %s426_s16 = scalar_lea.hbm %s585_s2, 128 }
  0x26   :  { %s39_s12 = sshll.u32 %s480_s11, 4  ;;  %p427_p2 = scmp.ne.s32.totalorder %s585_s2, %s426_s16  ;;  %s40_s12 = int_to_ptr.vmem [resolvable:$true] %s39_s12 }
  0x27   :  { %p430_p3 = scmp.lt.u32.totalorder %s426_s16, %s585_s2 }
  0x29   :  { %p432_p4 = pnand %p430_p3, %p427_p2 }
  0x2b   :  { %435 = shalt.err (!%p432_p4)
}
  0x2c   :  { %s436_s21 = scalar_lea.vmem %s40_s12, 128  ;;  %p441_p6 = scmp.lt.s32.totalorder %s40_s12, %s40_s12 }
  0x2d   :  { %p437_p5 = scmp.ne.s32.totalorder %s40_s12, %s436_s21  ;;  %p442_p7 = scmp.lt.s32.totalorder %s436_s21, %s436_s21 }
  0x2f   :  { %p443_p8 = por %p442_p7, %p441_p6 }
  0x31   :  { %p444_p9 = pnand %p443_p8, %p437_p5 }
  0x33   :  { %447 = shalt.err (!%p444_p9)
}
  0x34   :  { %42 = dma.hbm_to_vmem [thread:$0]  %s585_s2, 128, %s40_s12, [#allocation6]  }
  0x35   :  { %470 = dma.done.wait [#allocation3], 1024  }
  0x36   :  { %471 = vsyncadd [#allocation3], 4294966272 }
  0x37   :  { %472 = dma.done.wait [#allocation6], 256  }
  0x38   :  { %473 = vsyncadd [#allocation6], 4294967040  ;;  %v64_v0 = vlaneseq  ;;  %v481_v1 = vmov 1983009808   ;;  %v52_v9 = vld [vmem:[#allocation5] sm:$0xff]  ;;  %v53_v10 = vld [vmem:[#allocation7] sm:$0xff] }
  0x39   :  { %v117_v2 = vunpack.c.l.s4 %v481_v1  ;;  %v62_v15 = vsub.f32 %v53_v10, %v52_v9  ;;  %v370_v19 = vld [vmem:[#allocation2] ss:$16 sps:$4 sm:$0xff]   ;;  %v372_v20 = vld [vmem:[#allocation2 + $0x4] ss:$16 sps:$4 sm:$0xff]   ;;  %v376_v35 = vld [vmem:[#allocation2 + $0x8] ss:$16 sps:$4 sm:$0xff]  }
  0x3a   :  { %v65_v3 = vshrl.u32 %v64_v0, 7  ;;  %v373_v21 = vld [vmem:[#allocation2 + $0x20] ss:$16 sps:$4 sm:$0xff]   ;;  %v375_v29 = vld [vmem:[#allocation2 + $0x24] ss:$16 sps:$4 sm:$0xff]  }
  0x3b   :  { %v118_v4 = vunpack.c.0.s8 %v117_v2  ;;  %v378_v40 = vld [vmem:[#allocation2 + $0xc] ss:$16 sps:$4 sm:$0xff]   ;;  %v379_v41 = vld [vmem:[#allocation2 + $0x28] ss:$16 sps:$4 sm:$0xff]  }
  0x3c   :  { %v66_v5 = vsub.s32 0, %v65_v3  ;;  %v70_v6 = vsub.s32 1, %v65_v3  ;;  %v74_v7 = vsub.s32 2, %v65_v3  ;;  %v78_v8 = vsub.s32 3, %v65_v3  ;;  %v381_v42 = vld [vmem:[#allocation2 + $0x2c] ss:$16 sps:$4 sm:$0xff]  }
  0x3d   :  { %v550_v11 = vsub.s32 %v118_v4, %v65_v3  ;;  %v82_v12 = vsub.s32 4, %v65_v3  ;;  %v86_v13 = vsub.s32 5, %v65_v3  ;;  %v90_v14 = vsub.s32 6, %v65_v3 }
  0x3e   :  { %v204_v16 = vrot.slane %v52_v9, %v66_v5  ;;  %v208_v17 = vrot.slane %v52_v9, %v70_v6  ;;  %v94_v18 = vsub.s32 7, %v65_v3  ;;  %v212_v22 = vrot.slane %v52_v9, %v74_v7 }
  0x3f   :  { %v216_v23 = vrot.slane %v52_v9, %v78_v8  ;;  %v220_v24 = vrot.slane %v52_v9, %v82_v12  ;;  %v224_v25 = vrot.slane %v52_v9, %v86_v13  ;;  %v67_v26 = vrot.slane %v62_v15, %v66_v5 }
  0x40   :  { %v71_v27 = vrot.slane %v62_v15, %v70_v6  ;;  %v75_v28 = vrot.slane %v62_v15, %v74_v7  ;;  %v228_v30 = vrot.slane %v52_v9, %v90_v14  ;;  %v79_v31 = vrot.slane %v62_v15, %v78_v8 }
  0x41   :  { %v122_v32 = vrot.slane %v370_v19, %v550_v11  ;;  %v129_v33 = vrot.slane %v372_v20, %v550_v11  ;;  %v136_v34 = vrot.slane %v373_v21, %v550_v11  ;;  %v143_v36 = vrot.slane %v375_v29, %v550_v11 }
  0x42   :  { %v83_v37 = vrot.slane %v62_v15, %v82_v12  ;;  %v87_v38 = vrot.slane %v62_v15, %v86_v13  ;;  %v91_v39 = vrot.slane %v62_v15, %v90_v14  ;;  %v95_v45 = vrot.slane %v62_v15, %v94_v18 }
  0x43   :  { %v144_v43 = vcombine.low %v122_v32, %v136_v34  ;;  %v145_v44 = vcombine.high %v122_v32, %v136_v34  ;;  %v158_v46 = vrot.slane %v376_v35, %v550_v11  ;;  %v146_v47 = vcombine.low %v129_v33, %v143_v36 }
  0x44   :  { %v147_v48 = vcombine.high %v129_v33, %v143_v36  ;;  %v165_v49 = vrot.slane %v378_v40, %v550_v11  ;;  %v172_v50 = vrot.slane %v379_v41, %v550_v11  ;;  %v179_v53 = vrot.slane %v381_v42, %v550_v11 }
  0x45   :  { %v192_v51 = vmul.f32 %v144_v43, %v67_v26  ;;  %v193_v52 = vmul.f32 %v145_v44, %v71_v27  ;;  %v232_v54 = vrot.slane %v52_v9, %v94_v18  ;;  %v194_v55 = vmul.f32 %v146_v47, %v75_v28 }
  0x46   :  { %v195_v56 = vmul.f32 %v147_v48, %v79_v31  ;;  %v180_v57 = vcombine.low %v158_v46, %v172_v50  ;;  %v181_v58 = vcombine.high %v158_v46, %v172_v50  ;;  %v182_v61 = vcombine.low %v165_v49, %v179_v53 }
  0x47   :  { %v241_v59 = vadd.f32 %v204_v16, %v192_v51  ;;  %v242_v60 = vadd.f32 %v208_v17, %v193_v52  ;;  %v183_v62 = vcombine.high %v165_v49, %v179_v53  ;;  %v243_v63 = vadd.f32 %v212_v22, %v194_v55 }
  0x48   :  { %v244_v0 = vadd.f32 %v216_v23, %v195_v56  ;;  %v196_v1 = vmul.f32 %v180_v57, %v83_v37  ;;  %v197_v2 = vmul.f32 %v181_v58, %v87_v38  ;;  %v198_v4 = vmul.f32 %v182_v61, %v91_v39 }
  0x49   :  { %v257_v3 = vcombine.low %v241_v59, %v242_v60  ;;  %v199_v5 = vmul.f32 %v183_v62, %v95_v45  ;;  %v258_v6 = vcombine.high %v241_v59, %v242_v60 }
  0x4a   :  { %v259_v7 = vcombine.low %v243_v63, %v244_v0  ;;  %v245_v8 = vadd.f32 %v220_v24, %v196_v1  ;;  %v246_v10 = vadd.f32 %v224_v25, %v197_v2  ;;  %v260_v9 = vcombine.high %v243_v63, %v244_v0 }
  0x4b   :  { %v267_v12 = vrot.slane %v257_v3, %v550_v11  ;;  %v247_v13 = vadd.f32 %v228_v30, %v198_v4  ;;  %v248_v14 = vadd.f32 %v232_v54, %v199_v5  ;;  %v274_v15 = vrot.slane %v258_v6, %v550_v11 }
  0x4c   :  { %v281_v16 = vrot.slane %v259_v7, %v550_v11  ;;  %v293_v17 = vcombine.low %v245_v8, %v246_v10  ;;  %v288_v18 = vrot.slane %v260_v9, %v550_v11  ;;  %v294_v19 = vcombine.high %v245_v8, %v246_v10 }
  0x4d   :  { %v295_v20 = vcombine.low %v247_v13, %v248_v14  ;;  %v296_v21 = vcombine.high %v247_v13, %v248_v14 }
  0x4e   :  { %v289_v22 = vcombine.low %v267_v12, %v281_v16  ;;  %v303_v23 = vrot.slane %v293_v17, %v550_v11  ;;  %v290_v24 = vcombine.high %v267_v12, %v281_v16  ;;  %v291_v25 = vcombine.low %v274_v15, %v288_v18 }
  0x4f   :  { %v317_v26 = vrot.slane %v295_v20, %v550_v11  ;;  %v310_v27 = vrot.slane %v294_v19, %v550_v11  ;;  %v324_v28 = vrot.slane %v296_v21, %v550_v11  ;;  %v292_v29 = vcombine.high %v274_v15, %v288_v18 }
  0x50   :  { %337 = vst [vmem:[#allocation8] sm:$0xff] %v289_v22  ;;  %339 = vst [vmem:[#allocation8 + $0x10] sm:$0xff] %v290_v24 }
  0x51   :  { %341 = vst [vmem:[#allocation8 + $0x20] sm:$0xff] %v291_v25  ;;  %v325_v30 = vcombine.low %v303_v23, %v317_v26  ;;  %v326_v31 = vcombine.high %v303_v23, %v317_v26  ;;  %v327_v32 = vcombine.low %v310_v27, %v324_v28  ;;  %343 = vst [vmem:[#allocation8 + $0x30] sm:$0xff] %v292_v29 }
  0x52   :  { %v328_v33 = vcombine.high %v310_v27, %v324_v28 }
  0x53   :  { %338 = vst [vmem:[#allocation8 + $0x8] sm:$0xff] %v325_v30  ;;  %340 = vst [vmem:[#allocation8 + $0x18] sm:$0xff] %v326_v31 }
  0x54   :  { %342 = vst [vmem:[#allocation8 + $0x28] sm:$0xff] %v327_v32  ;;  %344 = vst [vmem:[#allocation8 + $0x38] sm:$0xff] %v328_v33 }
  0x55   :  { %349 = vsyncadd [#allocation4], 768  ;;  %s482_s2 = smov [#allocation8]  }
  0x56   :  { %s350_s22 = sshll.u32 %s482_s2, 4  ;;  %s351_s22 = int_to_ptr.vmem [resolvable:$true] %s350_s22 }
  0x57   :  { %s448_s23 = scalar_lea.vmem %s351_s22, 256  ;;  %s452_s24 = scalar_lea.vmem %s351_s22, 1024 }
  0x58   :  { %p449_p10 = scmp.ne.s32.totalorder %s351_s22, %s448_s23  ;;  %p453_p11 = scmp.lt.s32.totalorder %s351_s22, %s351_s22 }
  0x59   :  { %p454_p12 = scmp.lt.s32.totalorder %s452_s24, %s448_s23 }
  0x5b   :  { %p455_p13 = por %p454_p12, %p453_p11 }
  0x5d   :  { %p456_p0 = pnand %p455_p13, %p449_p10 }
  0x5f   :  { %459 = shalt.err (!%p456_p0)
}
  0x60   :  { %s460_s27 = scalar_lea.hbm %s586_s3, 256 }
  0x61   :  { %p461_p1 = scmp.ne.s32.totalorder %s586_s3, %s460_s27  ;;  %p464_p2 = scmp.lt.u32.totalorder %s460_s27, %s586_s3 }
  0x63   :  { %p466_p3 = pnand %p464_p2, %p461_p1 }
  0x65   :  { %469 = shalt.err (!%p466_p3)
}
  0x66   :  { %356 = dma.vmem_to_hbm [thread:$0]  %s351_s22, 256, %s586_s3, [#allocation4], %s478_s7, %s478_s7, %s479_s8  }
  0x67   :  { %474 = dma.done.wait [#allocation4], 1024  }
  0x68   :  { %475 = vsyncadd [#allocation4], 4294966272 }
  0x69   :  { %360 = vsyncpa [#allocation3], 1 }
  0x6a   :  { %361 = vsyncpa [#allocation6], 1 }
  0x6b   :  { %362 = vsyncpa [#allocation4], 1 }

</bundles_post_ra>
